<compile_context>
chip_gen: v5e
topology: v5e:2x2
jax: 0.10.0
libtpu: 0.0.40
codegen_flags: <defaults>
</compile_context>

<pallas_src>
import jax
import jax.numpy as jnp
from jax.experimental import pallas as pl
from jax.experimental.pallas import tpu as pltpu

_SUB, _LANE = 8, 128


def _round_up(v: int, m: int) -> int:
    return (v + m - 1) // m * m


def _interp_matrix(out_size: int, in_size: int) -> jnp.ndarray:
    """1-D bilinear interpolation matrix with align_corners=True semantics."""
    if in_size == 1:
        return jnp.ones((out_size, 1), dtype=jnp.float32)
    if out_size == 1:
        w = jnp.zeros((1, in_size), dtype=jnp.float32)
        return w.at[0, 0].set(1.0)
    coords = jnp.arange(out_size, dtype=jnp.float32) * (in_size - 1) / (out_size - 1)
    lo = jnp.clip(jnp.floor(coords).astype(jnp.int32), 0, in_size - 2)
    hi = lo + 1
    frac = coords - lo.astype(jnp.float32)
    rows = jnp.arange(out_size)
    w = jnp.zeros((out_size, in_size), dtype=jnp.float32)
    w = w.at[rows, lo].add(1.0 - frac)
    w = w.at[rows, hi].add(frac)
    return w


def _vmem_capacity_bytes() -> int:
    """Per-TensorCore VMEM capacity; conservative fallback fits every gen."""
    try:
        return int(pltpu.get_tpu_info().vmem_capacity_bytes)
    except Exception:
        return 64 * 1024 * 1024


def _step_vmem_bytes(th: int, h_in: int, w_in: int, w_out: int, itemsize: int):
    """Per-grid-step VMEM: (bc-independent, per-plane) byte counts."""
    r = _round_up
    th_pad = r(th, _SUB)
    x_pl = r(h_in, _SUB) * r(w_in, _LANE) * itemsize           # input plane block
    o_pl = th_pad * r(w_out, _LANE) * itemsize                 # output plane block
    wy_b = th_pad * r(h_in, _LANE) * 4                         # Wy row-tile block
    wxt_b = r(w_in, _SUB) * r(w_out, _LANE) * 4                # Wx^T block
    tmp = (r(h_in, _SUB) * r(w_in, _LANE)                      # x cast to f32
           + th_pad * r(h_in, _LANE)                           # Wy broadcast copy
           + th_pad * r(w_in, _LANE)                           # t = Wy @ x
           + th_pad * r(w_out, _LANE)) * 4                     # f32 result pre-cast
    tmp += o_pl                                                # cast/slice before store
    fixed = 2 * (wy_b + wxt_b)                                 # double-buffered weights
    per_plane = 2 * (x_pl + o_pl) + tmp                        # dbl-buffered I/O + temps
    return fixed, per_plane


def _plan_tiling(nc, h_in, w_in, h_out, w_out, itemsize, budget,
                 block_planes=None, h_tile=None):
    """Pick (bc planes per step, th output rows per step)."""
    def total(bc, th):
        fixed, per_plane = _step_vmem_bytes(th, h_in, w_in, w_out, itemsize)
        return fixed + bc * per_plane

    # ---- output-row tile -------------------------------------------------
    if h_tile is not None:
        th = min(int(h_tile), h_out)
        if th < h_out:
            th = max(_SUB, _round_up(th, _SUB))     # tiled blocks must be 8-aligned
    elif total(1, h_out) <= budget:
        th = h_out                                  # whole plane fits
    else:
        fit = [t for t in range(_SUB, h_out, _SUB) if total(1, t) <= budget]
        if not fit:
            th = _SUB
        else:
            div = [t for t in fit if h_out % t == 0]
            th = max(div) if div else max(fit)      # prefer exact divisor (no H pad)
    n_t = pl.cdiv(h_out, th)

    # ---- planes per step ---------------------------------------------------
    if block_planes is not None:
        bc = max(1, min(int(block_planes), nc))
    else:
        fixed, per_plane = _step_vmem_bytes(th, h_in, w_in, w_out, itemsize)
        avail = max(0, budget - fixed)
        bc = max(1, min(nc, avail // per_plane))
        # Keep enough grid steps for the 2-deep pipeline / megacore sharding,
        # but never shrink a block below ~2 MiB of output traffic.
        min_steps = 4
        if pl.cdiv(nc, bc) * n_t < min_steps:
            o_pl = _round_up(th, _SUB) * _round_up(w_out, _LANE) * itemsize
            bc_steps = max(1, pl.cdiv(nc, pl.cdiv(min_steps, n_t)))
            bc_floor = max(1, (2 * 1024 * 1024) // o_pl)
            bc = max(1, min(bc, max(bc_steps, bc_floor)))
    return int(bc), int(th)


def _upsample_kernel(wy_ref, wxt_ref, x_ref, o_ref):
    # wy_ref:  (th_pad, H_in)    row-interp matrix tile (zero-padded to 8-aligned)
    # wxt_ref: (W_in, W_out)     pre-transposed column-interp matrix
    # x_ref:   (BC, H_in, W_in)  BC input planes
    # o_ref:   (BC, th, W_out)   BC output-plane row tiles
    bc, h_in, w_in = x_ref.shape
    th_pad = wy_ref.shape[0]
    th = o_ref.shape[1]
    w_out = wxt_ref.shape[1]

    cd = wy_ref.dtype                               # MXU operand dtype (f32 or bf16)
    x = x_ref[...].astype(cd)

    # H-axis interpolation: batched MXU matmul.  The Wy broadcast is hoisted
    # (one copy per grid step) and is accounted for in the wrapper's budget.
    wy_b = jnp.broadcast_to(wy_ref[...], (bc, th_pad, h_in))
    t = jax.lax.dot_general(
        wy_b, x,
        dimension_numbers=(((2,), (1,)), ((0,), (0,))),
        preferred_element_type=jnp.float32)                      # (bc, th_pad, w_in)

    # W-axis interpolation: ONE flat GEMM with M = bc*th_pad rows.  th_pad is a
    # multiple of 8, so the leading-dim collapse is layout-free.
    out = jnp.dot(t.astype(cd).reshape(bc * th_pad, w_in), wxt_ref[...],
                  preferred_element_type=jnp.float32)            # (bc*th_pad, w_out)
    out = out.reshape(bc, th_pad, w_out)
    if th_pad != th:
        out = out[:, :th, :]                                     # drop padded rows
    o_ref[...] = out.astype(o_ref.dtype)


def bilinear_upsample(x: jnp.ndarray, scale: int, *, mxu_dtype=None,
                      block_planes=None, h_tile=None) -> jnp.ndarray:
    """x: (N, C, H, W) -> (N, C, H*scale, W*scale), bilinear, align_corners=True."""
    n, c, h, w = x.shape
    h_out, w_out = h * scale, w * scale
    nc = n * c
    itemsize = x.dtype.itemsize

    vmem_cap = _vmem_capacity_bytes()
    budget = int(vmem_cap * 0.40)                      # per-step working-set target
    vmem_limit = int(min(vmem_cap * 0.85, vmem_cap - (8 << 20)))

    bc, th = _plan_tiling(nc, h, w, h_out, w_out, itemsize, budget,
                          block_planes=block_planes, h_tile=h_tile)
    n_t = pl.cdiv(h_out, th)
    th_pad = _round_up(th, _SUB)
    h_grid = n_t * th                                  # >= h_out (padded if needed)
    nc_pad = pl.cdiv(nc, bc) * bc                      # >= nc   (padded if needed)

    w_dtype = jnp.dtype(mxu_dtype) if mxu_dtype is not None else jnp.dtype(jnp.float32)

    # Row-interpolation matrix, blocked per output-row tile; each tile holds
    # exactly th_pad (multiple of 8) rows, zero-padded past h_out.
    wy = _interp_matrix(h_out, h)                                  # (h_out, h)
    wy = jnp.pad(wy, ((0, h_grid - h_out), (0, 0)))                # (n_t*th, h)
    if th_pad != th:
        wy = wy.reshape(n_t, th, h)
        wy = jnp.pad(wy, ((0, 0), (0, th_pad - th), (0, 0)))
        wy = wy.reshape(n_t * th_pad, h)
    wy = wy.astype(w_dtype)
    wxt = _interp_matrix(w_out, w).T.astype(w_dtype)               # (w, w_out)

    x_flat = x.reshape(nc, h, w)
    if nc_pad != nc:
        x_flat = jnp.pad(x_flat, ((0, nc_pad - nc), (0, 0), (0, 0)))

    out_flat = pl.pallas_call(
        _upsample_kernel,
        out_shape=jax.ShapeDtypeStruct((nc_pad, h_grid, w_out), x.dtype),
        grid_spec=pltpu.PrefetchScalarGridSpec(
            num_scalar_prefetch=0,
            # h-tiles innermost: the input-plane block index is unchanged across
            # consecutive steps, so it is not re-fetched.
            grid=(nc_pad // bc, n_t),
            in_specs=[
                pl.BlockSpec((th_pad, h), lambda i, j: (j, 0)),    # Wy row tile
                pl.BlockSpec((w, w_out), lambda i, j: (0, 0)),     # Wx^T (invariant)
                pl.BlockSpec((bc, h, w), lambda i, j: (i, 0, 0)),  # input planes
            ],
            out_specs=pl.BlockSpec((bc, th, w_out), lambda i, j: (i, j, 0)),
        ),
        compiler_params=pltpu.CompilerParams(
            dimension_semantics=("parallel", "parallel"),
            vmem_limit_bytes=vmem_limit,
        ),
    )(wy, wxt, x_flat)

    out = out_flat[:nc, :h_out, :]
    return out.reshape(n, c, h_out, w_out)


class BilinearUpsampleBlock:
    """JAX/Pallas equivalent of the PyTorch BilinearUpsampleBlock.

    nn.Upsample is parameter-free, so there is nothing to initialize beyond the
    scale configuration.
    """

    def __init__(self, scale: int, multi_scale: bool):
        self.multi_scale = multi_scale
        self.scale = scale
        self.scales = (2, 3, 4, 5, 6) if multi_scale else (scale,)

    def __call__(self, x: jnp.ndarray, scale: int) -> jnp.ndarray:
        if self.multi_scale:
            assert scale in self.scales, f"unsupported scale {scale}"
            return bilinear_upsample(x, scale)
        return bilinear_upsample(x, self.scale)


def _reference(x: jnp.ndarray, scale: int) -> jnp.ndarray:
    """Pure-JAX reference (same separable formulation, no Pallas)."""
    wy = _interp_matrix(x.shape[2] * scale, x.shape[2])
    wx = _interp_matrix(x.shape[3] * scale, x.shape[3])
    return jnp.einsum("oh,nchw,pw->ncop", wy, x.astype(jnp.float32), wx).astype(x.dtype)


if __name__ == "__main__":
    key = jax.random.PRNGKey(0)
    x = jax.random.normal(key, (2, 4, 16, 16), dtype=jnp.float32)

    block = BilinearUpsampleBlock(scale=2, multi_scale=True)

    out2 = jax.block_until_ready(block(x, scale=2))
    assert out2.shape == (2, 4, 32, 32), out2.shape
    assert jnp.allclose(out2, _reference(x, 2), atol=1e-5, rtol=1e-5), "scale=2 mismatch"

    out3 = jax.block_until_ready(block(x, scale=3))
    assert out3.shape == (2, 4, 48, 48), out3.shape
    assert jnp.allclose(out3, _reference(x, 3), atol=1e-5, rtol=1e-5), "scale=3 mismatch"

    # Exercise the plane-padding and H_out-tiling paths (bc does not divide nc,
    # th does not divide h_out).
    out_t = jax.block_until_ready(bilinear_upsample(x, 2, block_planes=3, h_tile=24))
    assert out_t.shape == (2, 4, 32, 32), out_t.shape
    assert jnp.allclose(out_t, _reference(x, 2), atol=1e-5, rtol=1e-5), "tiled mismatch"

    # Non-8-aligned h_out exercises the padded-Wy / sliced-store path.
    x2 = jax.random.normal(jax.random.PRNGKey(0), (1, 2, 4, 4), dtype=jnp.float32)
    out5 = jax.block_until_ready(bilinear_upsample(x2, 3))
    assert out5.shape == (1, 2, 12, 12), out5.shape
    assert jnp.allclose(out5, _reference(x2, 3), atol=1e-5, rtol=1e-5), "pad mismatch"

    print("KERNEL_OK")
</pallas_src>

<mosaic_0001>
module attributes {stable_mosaic.version = 11 : i64} {
  func.func @_upsample_kernel(%arg0: i32, %arg1: i32, %arg2: memref<32x16xf32, #tpu.memory_space<vmem>>, %arg3: memref<16x32xf32, #tpu.memory_space<vmem>>, %arg4: memref<8x16x16xf32, #tpu.memory_space<vmem>>, %arg5: memref<8x32x32xf32, #tpu.memory_space<vmem>>) attributes {dimension_semantics = [#tpu.dimension_semantics<parallel>, #tpu.dimension_semantics<parallel>], iteration_bounds = array<i64: 1, 1>, scalar_prefetch = 0 : i64, scratch_operands = 0 : i64, tpu.core_type = #tpu.core_type<tc>, window_params = [{transform_indices = @transform_0, window_bounds = array<i64: 32, 16>}, {pipeline_mode = #tpu.pipeline_mode<synchronous>, transform_indices = @transform_1, window_bounds = array<i64: 16, 32>}, {transform_indices = @transform_2, window_bounds = array<i64: 8, 16, 16>}, {transform_indices = @transform_3, window_bounds = array<i64: 8, 32, 32>}]} {
    %c0 = arith.constant 0 : index
    %c0_0 = arith.constant 0 : index
    %c0_1 = arith.constant 0 : index
    %0 = vector.load %arg4[%c0, %c0_0, %c0_1] : memref<8x16x16xf32, #tpu.memory_space<vmem>>, vector<8x16x16xf32>
    %c0_2 = arith.constant 0 : index
    %c0_3 = arith.constant 0 : index
    %1 = vector.load %arg2[%c0_2, %c0_3] : memref<32x16xf32, #tpu.memory_space<vmem>>, vector<32x16xf32>
    %2 = vector.shape_cast %1 : vector<32x16xf32> to vector<1x32x16xf32>
    %3 = vector.broadcast %2 : vector<1x32x16xf32> to vector<8x32x16xf32>
    %cst = arith.constant dense<0.000000e+00> : vector<8x32x16xf32>
    %4 = tpu.matmul %3, %0, %cst {dimension_numbers = #tpu.dot_dimension_numbers<[2], [1], [1], [2], [0, 0, 0, 1, 1, 2], [0], [0]>} : vector<8x32x16xf32>, vector<8x16x16xf32>, vector<8x32x16xf32> -> vector<8x32x16xf32>
    %5 = vector.shape_cast %4 : vector<8x32x16xf32> to vector<256x16xf32>
    %c0_4 = arith.constant 0 : index
    %c0_5 = arith.constant 0 : index
    %6 = vector.load %arg3[%c0_4, %c0_5] : memref<16x32xf32, #tpu.memory_space<vmem>>, vector<16x32xf32>
    %cst_6 = arith.constant dense<0.000000e+00> : vector<256x32xf32>
    %7 = tpu.matmul %5, %6, %cst_6 {dimension_numbers = #tpu.dot_dimension_numbers<[1], [0], [0], [1], [0, 0, 1, 1], [], []>} : vector<256x16xf32>, vector<16x32xf32>, vector<256x32xf32> -> vector<256x32xf32>
    %8 = vector.shape_cast %7 : vector<256x32xf32> to vector<8x32x32xf32>
    %c0_7 = arith.constant 0 : index
    %c0_8 = arith.constant 0 : index
    %c0_9 = arith.constant 0 : index
    %9 = vector.load %arg5[%c0_7, %c0_8, %c0_9] : memref<8x32x32xf32, #tpu.memory_space<vmem>>, vector<8x32x32xf32>
    tpu.vector_store %arg5[%c0_7, %c0_8, %c0_9], %8 {strides = array<i32>} : memref<8x32x32xf32, #tpu.memory_space<vmem>>, vector<8x32x32xf32>,
    return
  }
  func.func @transform_0(%arg0: i32, %arg1: i32) -> (i32, i32) {
    %c0_i32 = arith.constant 0 : i32
    %c0_i32_0 = arith.constant 0 : i32
    return %arg1, %c0_i32 : i32, i32
  }
  func.func @transform_1(%arg0: i32, %arg1: i32) -> (i32, i32) {
    %c0_i32 = arith.constant 0 : i32
    %c0_i32_0 = arith.constant 0 : i32
    %c0_i32_1 = arith.constant 0 : i32
    return %c0_i32, %c0_i32_0 : i32, i32
  }
  func.func @transform_2(%arg0: i32, %arg1: i32) -> (i32, i32, i32) {
    %c0_i32 = arith.constant 0 : i32
    %c0_i32_0 = arith.constant 0 : i32
    %c0_i32_1 = arith.constant 0 : i32
    return %arg0, %c0_i32, %c0_i32_0 : i32, i32, i32
  }
  func.func @transform_3(%arg0: i32, %arg1: i32) -> (i32, i32, i32) {
    %c0_i32 = arith.constant 0 : i32
    %c0_i32_0 = arith.constant 0 : i32
    return %arg0, %arg1, %c0_i32 : i32, i32, i32
  }
}

</mosaic_0001>

<bundles_post_ra>
// kernel: tpu_custom_call.1
= control target key start
LH: loop header
LB: loop body
LE: loop exit
PB: predicated region body
PF: predicated region fallthrough
CT: control target
= control target key end

     0   :  { %8 = vsyncpa [#allocation3], 0  ;;  %s835_s0 = inlined_call_operand.vmem [shape: f32[32,16], index: 0, kind: input, shape index: {}]   ;;  %s836_s1 = inlined_call_operand.vmem [shape: f32[16,32], index: 1, kind: input, shape index: {}]   ;;  %s837_s2 = inlined_call_operand.hbm [shape: f32[8,16,16], index: 2, kind: input, shape index: {}]   ;;  %s838_s3 = inlined_call_operand.hbm [shape: f32[8,32,32], index: 3, kind: output, shape index: {}]  }
   0x1   :  { %9 = vsyncpa [#allocation4], 0  ;;  %s18_s14 = sshll.u32 %s837_s2, 4  ;;  %s685_s15 = smov [#allocation2]   ;;  %s19_s14 = int_to_ptr.hbm [resolvable:$true] %s18_s14 }
   0x2   :  { %s20_s16 = sshll.u32 %s685_s15, 4  ;;  %s686_s17 = smov 128   ;;  %s21_s16 = int_to_ptr.vmem [resolvable:$true] %s20_s16 }
   0x3   :  { %s687_s18 = smov 8  }
   0x4   :  { %26 = dma.hbm_to_vmem [thread:$0]  %s19_s14, 2048, %s21_s16, [#allocation3], %s686_s17, %s686_s17, %s687_s18  }
   0x5   :  { %681 = dma.done.wait [#allocation3], 2048  }
   0x6   :  { %682 = vsyncadd [#allocation3], 4294965248  ;;  %v36_v0 = vld [vmem:[#allocation2 + $0x28] sm:$0xff]  ;;  %v35_v1 = vld [vmem:[#allocation2 + $0x20] sm:$0xff]  ;;  %vm51_vm0 = vcmask 130048   ;;  %vm507_vm1 = vcmask 261120  }
   0x7   :  { %136 = vmatpush.msra.mxu2 %v36_v0  ;;  %v47_v2 = vld [vmem:[%s835_s0] sm:$0xff]  ;;  %v32_v3 = vld [vmem:[#allocation2 + $0x8] sm:$0xff]  ;;  %v38_v8 = vld [vmem:[#allocation2 + $0x38] sm:$0xff]  ;;  %s546_s5 = sshll.u32 %s838_s3, 4  ;;  %s547_s5 = int_to_ptr.hbm [resolvable:$true] %s546_s5 }
   0x8   :  { %v31_v4 = vld [vmem:[#allocation2] sm:$0xff]  ;;  %v44_v5 = vld [vmem:[#allocation2 + $0x68] sm:$0xff]  ;;  %78 = vmatpush.msra.mxu0 %v32_v3  ;;  %v37_v10 = vld [vmem:[#allocation2 + $0x30] sm:$0xff]  ;;  %165 = vmatpush.msra.mxu3 %v38_v8 }
   0x9   :  { %137 = vmatpush.msra.mxu2 %v35_v1  ;;  %v40_v6 = vld [vmem:[#allocation2 + $0x48] sm:$0xff]  ;;  %v43_v7 = vld [vmem:[#allocation2 + $0x60] sm:$0xff]  ;;  %v34_v11 = vld [vmem:[#allocation2 + $0x18] sm:$0xff] }
   0xa   :  { %567 = vmatmul.msk.f32.vlgmr.msra.gmra.mxu2 %vm51_vm0, %v47_v2  ;;  %79 = vmatpush.msra.mxu0 %v31_v4  ;;  %v39_v9 = vld [vmem:[#allocation2 + $0x40] sm:$0xff]  ;;  %v33_v12 = vld [vmem:[#allocation2 + $0x10] sm:$0xff]  ;;  %v46_v13 = vld [vmem:[#allocation2 + $0x78] sm:$0xff] }
   0xb   :  { %252 = vmatpush.msrb.mxu2 %v44_v5  ;;  %559 = vmatmul.msk.f32.vlgmr.msra.gmra.mxu0 %vm51_vm0, %v47_v2  ;;  %v42_v14 = vld [vmem:[#allocation2 + $0x58] sm:$0xff]  ;;  %v48_v15 = vld [vmem:[%s835_s0 + $0x8] sm:$0xff]  ;;  %v49_v16 = vld [vmem:[%s835_s0 + $0x10] sm:$0xff] }
   0xc   :  { %194 = vmatpush.msrb.mxu0 %v40_v6  ;;  %107 = vmatpush.msra.mxu1 %v34_v11  ;;  %v45_v17 = vld [vmem:[#allocation2 + $0x70] sm:$0xff]  ;;  %v50_v19 = vld [vmem:[%s835_s0 + $0x18] sm:$0xff]  ;;  %v297_v20 = vld [vmem:[%s836_s1 + $0x8] sm:$0xff] }
   0xd   :  { %253 = vmatpush.msrb.mxu2 %v43_v7  ;;  %166 = vmatpush.msra.mxu3 %v37_v10  ;;  %v41_v18 = vld [vmem:[#allocation2 + $0x50] sm:$0xff]  ;;  %v296_v21 = vld [vmem:[%s836_s1] sm:$0xff]  ;;  %s688_s1 = smov [#allocation5]  }
   0xe   :  { %195 = vmatpush.msrb.mxu0 %v39_v9  ;;  %571 = vmatmul.msk.f32.vlgmr.msra.gmra.mxu3 %vm51_vm0, %v47_v2  ;;  %s544_s29 = sshll.u32 %s688_s1, 4  ;;  %s545_s29 = int_to_ptr.vmem [resolvable:$true] %s544_s29 }
   0xf   :  { %108 = vmatpush.msra.mxu1 %v33_v12  ;;  %281 = vmatpush.msrb.mxu3 %v46_v13 }
  0x10   :  { %563 = vmatmul.msk.f32.vlgmr.msra.gmra.mxu1 %vm51_vm0, %v47_v2  ;;  %408 = vmatpush.msra.mxu0 %v297_v20 }
  0x11   :  { %223 = vmatpush.msrb.mxu1 %v42_v14  ;;  %282 = vmatpush.msrb.mxu3 %v45_v17 }
  0x12   :  { %568 = vmatmul.msk.f32.gmra.mxu2 %vm51_vm0, %v48_v15  ;;  %409 = vmatpush.msra.mxu0 %v296_v21 }
  0x13   :  { %560 = vmatmul.msk.f32.gmra.mxu0 %vm51_vm0, %v48_v15  ;;  %224 = vmatpush.msrb.mxu1 %v41_v18 }
  0x14   :  { %625 = vmatpush.msra.mxu3 %v297_v20  ;;  %624 = vmatpush.msra.mxu2 %v297_v20 }
  0x15   :  { %623 = vmatpush.msra.mxu1 %v297_v20 }
  0x16   :  { %572 = vmatmul.msk.f32.gmra.mxu3 %vm51_vm0, %v48_v15  ;;  %627 = vmatpush.msra.mxu2 %v296_v21 }
  0x17   :  { %626 = vmatpush.msra.mxu1 %v296_v21  ;;  %628 = vmatpush.msra.mxu3 %v296_v21 }
  0x18   :  { %564 = vmatmul.msk.f32.gmra.mxu1 %vm51_vm0, %v48_v15 }
  0x1a   :  { %569 = vmatmul.msk.f32.gmra.mxu2 %vm51_vm0, %v49_v16 }
  0x1b   :  { %561 = vmatmul.msk.f32.gmra.mxu0 %vm51_vm0, %v49_v16 }
  0x1e   :  { %573 = vmatmul.msk.f32.gmra.mxu3 %vm51_vm0, %v49_v16 }
  0x20   :  { %565 = vmatmul.msk.f32.gmra.mxu1 %vm51_vm0, %v49_v16 }
  0x22   :  { %570 = vmatmul.msk.f32.gmra.mxu2 %vm51_vm0, %v50_v19 }
  0x23   :  { %562 = vmatmul.msk.f32.gmra.mxu0 %vm51_vm0, %v50_v19 }
  0x26   :  { %574 = vmatmul.msk.f32.gmra.mxu3 %vm51_vm0, %v50_v19 }
  0x28   :  { %566 = vmatmul.msk.f32.gmra.mxu1 %vm51_vm0, %v50_v19 }
  0x2a   :  { %583 = vmatmul.msk.f32.vlgmr.msrb.gmra.mxu2 %vm51_vm0, %v47_v2 }
  0x2b   :  { %575 = vmatmul.msk.f32.vlgmr.msrb.gmra.mxu0 %vm51_vm0, %v47_v2 }
  0x2e   :  { %587 = vmatmul.msk.f32.vlgmr.msrb.gmra.mxu3 %vm51_vm0, %v47_v2 }
  0x30   :  { %579 = vmatmul.msk.f32.vlgmr.msrb.gmra.mxu1 %vm51_vm0, %v47_v2 }
  0x32   :  { %584 = vmatmul.msk.f32.gmra.mxu2 %vm51_vm0, %v48_v15 }
  0x33   :  { %576 = vmatmul.msk.f32.gmra.mxu0 %vm51_vm0, %v48_v15 }
  0x36   :  { %588 = vmatmul.msk.f32.gmra.mxu3 %vm51_vm0, %v48_v15 }
  0x38   :  { %580 = vmatmul.msk.f32.gmra.mxu1 %vm51_vm0, %v48_v15 }
  0x3a   :  { %585 = vmatmul.msk.f32.gmra.mxu2 %vm51_vm0, %v49_v16 }
  0x3b   :  { %577 = vmatmul.msk.f32.gmra.mxu0 %vm51_vm0, %v49_v16 }
  0x3e   :  { %589 = vmatmul.msk.f32.gmra.mxu3 %vm51_vm0, %v49_v16 }
  0x40   :  { %581 = vmatmul.msk.f32.gmra.mxu1 %vm51_vm0, %v49_v16 }
  0x42   :  { %586 = vmatmul.msk.f32.gmra.mxu2 %vm51_vm0, %v50_v19 }
  0x43   :  { %578 = vmatmul.msk.f32.gmra.mxu0 %vm51_vm0, %v50_v19 }
  0x46   :  { %590 = vmatmul.msk.f32.gmra.mxu3 %vm51_vm0, %v50_v19 }
  0x48   :  { %582 = vmatmul.msk.f32.gmra.mxu1 %vm51_vm0, %v50_v19 }
  0x88   :  { %v81_v22 = vpop.f32.mrf.mxu0 }
  0x89   :  { %591 = vmatmul.msk.f32.vlgmr.msra.gmra.mxu0 %vm51_vm0, %v81_v22 }
  0x8d   :  { %v139_v23 = vpop.f32.mrf.mxu2  ;;  %v110_v27 = vpop.f32.mrf.mxu1 }
  0x8e   :  { %599 = vmatmul.msk.f32.vlgmr.msra.gmra.mxu1 %vm51_vm0, %v139_v23 }
  0x90   :  { %v84_v24 = vpop.f32.mrf.mxu0 }
  0x91   :  { %592 = vmatmul.msk.f32.gmra.mxu0 %vm51_vm0, %v84_v24  ;;  %v168_v29 = vpop.f32.mrf.mxu3 }
  0x95   :  { %v142_v25 = vpop.f32.mrf.mxu2  ;;  %v113_v31 = vpop.f32.mrf.mxu1 }
  0x96   :  { %600 = vmatmul.msk.f32.gmra.mxu1 %vm51_vm0, %v142_v25 }
  0x98   :  { %v87_v26 = vpop.f32.mrf.mxu0 }
  0x99   :  { %593 = vmatmul.msk.f32.gmra.mxu0 %vm51_vm0, %v87_v26  ;;  %v171_v33 = vpop.f32.mrf.mxu3 }
  0x9d   :  { %v145_v28 = vpop.f32.mrf.mxu2  ;;  %v116_v35 = vpop.f32.mrf.mxu1 }
  0x9e   :  { %601 = vmatmul.msk.f32.gmra.mxu1 %vm51_vm0, %v145_v28 }
  0xa0   :  { %v90_v30 = vpop.f32.mrf.mxu0 }
  0xa1   :  { %594 = vmatmul.msk.f32.gmra.mxu0 %vm51_vm0, %v90_v30  ;;  %v174_v38 = vpop.f32.mrf.mxu3 }
  0xa5   :  { %v148_v32 = vpop.f32.mrf.mxu2  ;;  %v119_v40 = vpop.f32.mrf.mxu1 }
  0xa6   :  { %602 = vmatmul.msk.f32.gmra.mxu1 %vm51_vm0, %v148_v32 }
  0xa8   :  { %v197_v34 = vpop.f32.mrf.mxu0 }
  0xa9   :  { %595 = vmatmul.msk.f32.gmra.mxu0 %vm51_vm0, %v110_v27  ;;  %607 = vmatmul.msk.f32.vlgmr.msra.gmra.mxu2 %vm51_vm0, %v197_v34  ;;  %v177_v42 = vpop.f32.mrf.mxu3 }
  0xad   :  { %v255_v36 = vpop.f32.mrf.mxu2  ;;  %v226_v45 = vpop.f32.mrf.mxu1 }
  0xae   :  { %603 = vmatmul.msk.f32.gmra.mxu1 %vm51_vm0, %v168_v29  ;;  %615 = vmatmul.msk.f32.vlgmr.msra.gmra.mxu3 %vm51_vm0, %v255_v36 }
  0xb0   :  { %v200_v37 = vpop.f32.mrf.mxu0 }
  0xb1   :  { %596 = vmatmul.msk.f32.gmra.mxu0 %vm51_vm0, %v113_v31  ;;  %608 = vmatmul.msk.f32.gmra.mxu2 %vm51_vm0, %v200_v37  ;;  %v284_v47 = vpop.f32.mrf.mxu3 }
  0xb5   :  { %v258_v39 = vpop.f32.mrf.mxu2  ;;  %v229_v48 = vpop.f32.mrf.mxu1 }
  0xb6   :  { %604 = vmatmul.msk.f32.gmra.mxu1 %vm51_vm0, %v171_v33  ;;  %616 = vmatmul.msk.f32.gmra.mxu3 %vm51_vm0, %v258_v39 }
  0xb8   :  { %v203_v41 = vpop.f32.mrf.mxu0 }
  0xb9   :  { %597 = vmatmul.msk.f32.gmra.mxu0 %vm51_vm0, %v116_v35  ;;  %609 = vmatmul.msk.f32.gmra.mxu2 %vm51_vm0, %v203_v41  ;;  %v287_v49 = vpop.f32.mrf.mxu3 }
  0xbd   :  { %v261_v43 = vpop.f32.mrf.mxu2  ;;  %v232_v50 = vpop.f32.mrf.mxu1 }
  0xbe   :  { %605 = vmatmul.msk.f32.gmra.mxu1 %vm51_vm0, %v174_v38  ;;  %617 = vmatmul.msk.f32.gmra.mxu3 %vm51_vm0, %v261_v43 }
  0xc0   :  { %v206_v44 = vpop.f32.mrf.mxu0 }
  0xc1   :  { %598 = vmatmul.msk.f32.gmra.mxu0 %vm51_vm0, %v119_v40  ;;  %610 = vmatmul.msk.f32.gmra.mxu2 %vm51_vm0, %v206_v44  ;;  %v290_v51 = vpop.f32.mrf.mxu3 }
  0xc5   :  { %v264_v46 = vpop.f32.mrf.mxu2  ;;  %v235_v52 = vpop.f32.mrf.mxu1 }
  0xc6   :  { %606 = vmatmul.msk.f32.gmra.mxu1 %vm51_vm0, %v177_v42  ;;  %618 = vmatmul.msk.f32.gmra.mxu3 %vm51_vm0, %v264_v46 }
  0xc9   :  { %611 = vmatmul.msk.f32.gmra.mxu2 %vm51_vm0, %v226_v45  ;;  %v293_v53 = vpop.f32.mrf.mxu3 }
  0xce   :  { %619 = vmatmul.msk.f32.gmra.mxu3 %vm51_vm0, %v284_v47 }
  0xd1   :  { %612 = vmatmul.msk.f32.gmra.mxu2 %vm51_vm0, %v229_v48 }
  0xd6   :  { %620 = vmatmul.msk.f32.gmra.mxu3 %vm51_vm0, %v287_v49 }
  0xd9   :  { %613 = vmatmul.msk.f32.gmra.mxu2 %vm51_vm0, %v232_v50 }
  0xde   :  { %621 = vmatmul.msk.f32.gmra.mxu3 %vm51_vm0, %v290_v51 }
  0xe1   :  { %614 = vmatmul.msk.f32.gmra.mxu2 %vm51_vm0, %v235_v52 }
  0xe6   :  { %622 = vmatmul.msk.f32.gmra.mxu3 %vm51_vm0, %v293_v53 }
 0x106   :  { %v411_v54 = vpop.f32.mrf.mxu0 }
 0x107   :  { %508 = vst.msk [vmem:[#allocation5] sm:$0xff] %vm507_vm1, %v411_v54 }
 0x10b   :  { %v435_v55 = vpop.f32.mrf.mxu1 }
 0x10c   :  { %516 = vst.msk [vmem:[#allocation5 + $0x40] sm:$0xff] %vm507_vm1, %v435_v55 }
 0x10e   :  { %v414_v56 = vpop.f32.mrf.mxu0 }
 0x10f   :  { %509 = vst.msk [vmem:[#allocation5 + $0x8] sm:$0xff] %vm507_vm1, %v414_v56 }
 0x113   :  { %v438_v57 = vpop.f32.mrf.mxu1 }
 0x114   :  { %517 = vst.msk [vmem:[#allocation5 + $0x48] sm:$0xff] %vm507_vm1, %v438_v57 }
 0x116   :  { %v417_v58 = vpop.f32.mrf.mxu0 }
 0x117   :  { %510 = vst.msk [vmem:[#allocation5 + $0x10] sm:$0xff] %vm507_vm1, %v417_v58 }
 0x11b   :  { %v441_v59 = vpop.f32.mrf.mxu1 }
 0x11c   :  { %518 = vst.msk [vmem:[#allocation5 + $0x50] sm:$0xff] %vm507_vm1, %v441_v59 }
 0x11e   :  { %v420_v60 = vpop.f32.mrf.mxu0 }
 0x11f   :  { %511 = vst.msk [vmem:[#allocation5 + $0x18] sm:$0xff] %vm507_vm1, %v420_v60 }
 0x123   :  { %v444_v61 = vpop.f32.mrf.mxu1 }
 0x124   :  { %519 = vst.msk [vmem:[#allocation5 + $0x58] sm:$0xff] %vm507_vm1, %v444_v61 }
 0x126   :  { %v423_v62 = vpop.f32.mrf.mxu0 }
 0x127   :  { %512 = vst.msk [vmem:[#allocation5 + $0x20] sm:$0xff] %vm507_vm1, %v423_v62 }
 0x12b   :  { %v447_v63 = vpop.f32.mrf.mxu1 }
 0x12c   :  { %520 = vst.msk [vmem:[#allocation5 + $0x60] sm:$0xff] %vm507_vm1, %v447_v63  ;;  %v459_v0 = vpop.f32.mrf.mxu2 }
 0x12d   :  { %524 = vst.msk [vmem:[#allocation5 + $0x80] sm:$0xff] %vm507_vm1, %v459_v0 }
 0x12e   :  { %v426_v1 = vpop.f32.mrf.mxu0 }
 0x12f   :  { %513 = vst.msk [vmem:[#allocation5 + $0x28] sm:$0xff] %vm507_vm1, %v426_v1 }
 0x131   :  { %v483_v2 = vpop.f32.mrf.mxu3 }
 0x132   :  { %532 = vst.msk [vmem:[#allocation5 + $0xc0] sm:$0xff] %vm507_vm1, %v483_v2 }
 0x133   :  { %v450_v3 = vpop.f32.mrf.mxu1 }
 0x134   :  { %521 = vst.msk [vmem:[#allocation5 + $0x68] sm:$0xff] %vm507_vm1, %v450_v3  ;;  %v462_v4 = vpop.f32.mrf.mxu2 }
 0x135   :  { %525 = vst.msk [vmem:[#allocation5 + $0x88] sm:$0xff] %vm507_vm1, %v462_v4 }
 0x136   :  { %v429_v5 = vpop.f32.mrf.mxu0 }
 0x137   :  { %514 = vst.msk [vmem:[#allocation5 + $0x30] sm:$0xff] %vm507_vm1, %v429_v5 }
 0x139   :  { %v486_v6 = vpop.f32.mrf.mxu3 }
 0x13a   :  { %533 = vst.msk [vmem:[#allocation5 + $0xc8] sm:$0xff] %vm507_vm1, %v486_v6 }
 0x13b   :  { %v453_v7 = vpop.f32.mrf.mxu1 }
 0x13c   :  { %522 = vst.msk [vmem:[#allocation5 + $0x70] sm:$0xff] %vm507_vm1, %v453_v7  ;;  %v465_v8 = vpop.f32.mrf.mxu2 }
 0x13d   :  { %526 = vst.msk [vmem:[#allocation5 + $0x90] sm:$0xff] %vm507_vm1, %v465_v8 }
 0x13e   :  { %v432_v9 = vpop.f32.mrf.mxu0 }
 0x13f   :  { %515 = vst.msk [vmem:[#allocation5 + $0x38] sm:$0xff] %vm507_vm1, %v432_v9 }
 0x141   :  { %v489_v10 = vpop.f32.mrf.mxu3 }
 0x142   :  { %534 = vst.msk [vmem:[#allocation5 + $0xd0] sm:$0xff] %vm507_vm1, %v489_v10 }
 0x143   :  { %v456_v11 = vpop.f32.mrf.mxu1 }
 0x144   :  { %523 = vst.msk [vmem:[#allocation5 + $0x78] sm:$0xff] %vm507_vm1, %v456_v11  ;;  %v468_v12 = vpop.f32.mrf.mxu2 }
 0x145   :  { %527 = vst.msk [vmem:[#allocation5 + $0x98] sm:$0xff] %vm507_vm1, %v468_v12 }
 0x149   :  { %v492_v13 = vpop.f32.mrf.mxu3 }
 0x14a   :  { %535 = vst.msk [vmem:[#allocation5 + $0xd8] sm:$0xff] %vm507_vm1, %v492_v13 }
 0x14c   :  { %v471_v14 = vpop.f32.mrf.mxu2 }
 0x14d   :  { %528 = vst.msk [vmem:[#allocation5 + $0xa0] sm:$0xff] %vm507_vm1, %v471_v14 }
 0x151   :  { %v495_v15 = vpop.f32.mrf.mxu3 }
 0x152   :  { %536 = vst.msk [vmem:[#allocation5 + $0xe0] sm:$0xff] %vm507_vm1, %v495_v15 }
 0x154   :  { %v474_v16 = vpop.f32.mrf.mxu2 }
 0x155   :  { %529 = vst.msk [vmem:[#allocation5 + $0xa8] sm:$0xff] %vm507_vm1, %v474_v16 }
 0x159   :  { %v498_v17 = vpop.f32.mrf.mxu3 }
 0x15a   :  { %537 = vst.msk [vmem:[#allocation5 + $0xe8] sm:$0xff] %vm507_vm1, %v498_v17 }
 0x15c   :  { %v477_v18 = vpop.f32.mrf.mxu2 }
 0x15d   :  { %530 = vst.msk [vmem:[#allocation5 + $0xb0] sm:$0xff] %vm507_vm1, %v477_v18 }
 0x161   :  { %v501_v19 = vpop.f32.mrf.mxu3 }
 0x162   :  { %538 = vst.msk [vmem:[#allocation5 + $0xf0] sm:$0xff] %vm507_vm1, %v501_v19 }
 0x164   :  { %v480_v20 = vpop.f32.mrf.mxu2 }
 0x165   :  { %531 = vst.msk [vmem:[#allocation5 + $0xb8] sm:$0xff] %vm507_vm1, %v480_v20 }
 0x169   :  { %v504_v21 = vpop.f32.mrf.mxu3 }
 0x16a   :  { %539 = vst.msk [vmem:[#allocation5 + $0xf8] sm:$0xff] %vm507_vm1, %v504_v21 }
 0x16b   :  { %552 = dma.vmem_to_hbm [thread:$0]  %s545_s29, 4096, %s547_s5, [#allocation4], %s686_s17, %s686_s17, %s687_s18  }
 0x16c   :  { %683 = dma.done.wait [#allocation4], 4096  }
 0x16d   :  { %684 = vsyncadd [#allocation4], 4294963200 }
 0x16e   :  { %557 = vsyncpa [#allocation3], 1 }
 0x16f   :  { %558 = vsyncpa [#allocation4], 1 }

</bundles_post_ra>
